<compile_context>
chip_gen: v6e
topology: v6e:2x2x1
jax: 0.10.0
libtpu: 0.0.40
codegen_flags: <defaults>
</compile_context>

<pallas_src>
import jax
import jax.numpy as jnp
from jax import lax
from jax.experimental import pallas as pl
from jax.experimental.pallas import tpu as pltpu


_LANE = 128


def _round_up(x, m):
    return (x + m - 1) // m * m


def _vmem_capacity_bytes():
    """Generation-aware VMEM capacity (v5e/v6e: 128 MiB, v7x: 64 MiB/core)."""
    try:
        info = pltpu.get_tpu_info()
        cap = int(getattr(info, "vmem_capacity_bytes", 0) or 0)
        if cap > 0:
            return cap
    except Exception:
        pass
    return 64 * 1024 * 1024   # conservative fallback (v7x per-core VMEM)


def _pick_tile(M, need_fn, budget, tm_max=4096, tm_min=128, min_steps=8):
    """Largest row tile that fits the VMEM budget, preferring >= min_steps
    grid steps (pipeline overlap + megacore sharding).  Tiles stay multiples
    of 8 (sublane) and >= 128 rows (MXU-friendly)."""
    tm = max(tm_min, min(tm_max, _round_up(M, _LANE)))
    while tm > tm_min and need_fn(tm) > budget:
        tm //= 2
    while tm > tm_min and (M + tm - 1) // tm < min_steps:
        tm //= 2
    return max(tm_min, tm)


# --------------------------- fused deform kernel ---------------------------

def _deform_kernel(v_ref, w_ref, bmat_ref, wc_ref, b_ref, o_ref):
    # v:    (TM, 4K)   bf16  gathered corner values, K4 order = (tap, corner, chan)
    # w:    (TM, 4kk)  f32   per-(tap, corner) bilinear weights
    # bmat: (4kk, 4K)  f32   constant 0/1 channel-broadcast matrix
    # wc:   (4K, Cop)  bf16  conv weight stacked over the 4 corners
    # b:    (1, Cop)   f32 ; o: (TM, Cop) bf16
    wexp = jnp.dot(w_ref[...], bmat_ref[...],
                   preferred_element_type=jnp.float32)        # (TM, 4K) f32
    s = wexp.astype(jnp.bfloat16) * v_ref[...]                # (TM, 4K) bf16
    acc = jnp.dot(s, wc_ref[...],
                  preferred_element_type=jnp.float32) + b_ref[...]
    o_ref[...] = acc.astype(o_ref.dtype)


def _deform_sample_conv(v_cat, w_cat, bmat, wc_stack, bias):
    """out[m, :] = (sum over taps/corners of bilinear-weighted samples) @ conv."""
    M, K4 = v_cat.shape
    kk4 = w_cat.shape[1]
    Co = wc_stack.shape[1]
    Cop = _round_up(Co, _LANE)

    wcp = jnp.pad(wc_stack, ((0, 0), (0, Cop - Co))).astype(jnp.bfloat16)
    bp = jnp.pad(bias.reshape(1, Co).astype(jnp.float32), ((0, 0), (0, Cop - Co)))

    # --- VMEM accounting (lane-padded), per review: streams are double
    # buffered, constants are counted double-buffered, and the live (tm, K4)
    # f32 wexp + bf16 s intermediates are included.  For very large K4 the
    # budget shrinks tm instead of chunking the contraction.
    K4p = _round_up(K4, _LANE)
    kk4p = _round_up(kk4, _LANE)
    stream_row = 2 * K4p + 4 * kk4p + 2 * Cop          # bf16 v + f32 w + bf16 out
    live_row = 6 * K4p                                  # f32 wexp + bf16 s
    const_bytes = (4 * _round_up(kk4, 8) * K4p          # bmat f32
                   + 2 * _round_up(K4, 16) * Cop        # wc bf16
                   + 4 * 8 * Cop)                       # bias f32

    cap = _vmem_capacity_bytes()
    budget = cap // 2

    def need(tm):
        return 2 * tm * stream_row + tm * live_row + 2 * const_bytes + (4 << 20)

    tm = _pick_tile(M, need, budget)
    Mp = _round_up(M, tm)
    vp = jnp.pad(v_cat, ((0, Mp - M), (0, 0)))
    wp = jnp.pad(w_cat, ((0, Mp - M), (0, 0)))

    vmem_limit = int(min(int(cap * 0.75), max(need(tm) + (8 << 20), 24 << 20)))

    out = pl.pallas_call(
        _deform_kernel,
        out_shape=jax.ShapeDtypeStruct((Mp, Cop), jnp.bfloat16),
        grid_spec=pltpu.PrefetchScalarGridSpec(
            num_scalar_prefetch=0,
            grid=(Mp // tm,),
            in_specs=[
                pl.BlockSpec((tm, K4), lambda i: (i, 0)),       # corner values
                pl.BlockSpec((tm, kk4), lambda i: (i, 0)),      # bilinear weights
                pl.BlockSpec((kk4, K4), lambda i: (0, 0)),      # bmat  (resident)
                pl.BlockSpec((K4, Cop), lambda i: (0, 0)),      # wc    (resident)
                pl.BlockSpec((1, Cop), lambda i: (0, 0)),       # bias  (resident)
            ],
            out_specs=pl.BlockSpec((tm, Cop), lambda i: (i, 0)),
        ),
        compiler_params=pltpu.CompilerParams(
            dimension_semantics=("parallel",),
            vmem_limit_bytes=vmem_limit),
    )(vp, wp, bmat, wcp, bp)
    return out[:M, :Co]


# ---------------------------- deform_conv_v1 port ---------------------------

class DeformConvV1:
    def __init__(self, in_channels, out_channels, kernel_size, stride,
                 padding, key):
        self.cin = in_channels
        self.cout = out_channels
        self.k = kernel_size
        self.s = stride
        self.p = padding
        k = kernel_size
        k3, k4 = jax.random.split(key, 2)
        # Matches the reference module: the offset conv (p_conv) is zero-init.
        self.p_w = jnp.zeros((2 * k * k, in_channels, k, k), jnp.float32)
        self.p_b = jnp.zeros((2 * k * k,), jnp.float32)
        fan_in = in_channels * k * k
        bound = 1.0 / (fan_in ** 0.5)
        self.w = jax.random.uniform(
            k3, (out_channels, in_channels, k, k), jnp.float32, -bound, bound)
        self.b = jax.random.uniform(
            k4, (out_channels,), jnp.float32, -bound, bound)

    def __call__(self, x):
        N, C, H, W = x.shape
        k, s, p = self.k, self.s, self.p
        kk = k * k

        x_pad = jnp.pad(x, ((0, 0), (0, 0), (p, p), (p, p)))
        P = H + 2 * p
        assert P == W + 2 * p, "only square inputs (H == W) supported"
        h_out = (P - k) // s + 1
        w_out = (P - k) // s + 1
        M = N * h_out * w_out

        x_nhwc = x_pad.transpose(0, 2, 3, 1)                   # (N, P, P, C) f32

        # ---------------- offset conv (p_conv), f32, no im2col ----------------
        # TODO(synk): the small 2*k*k-channel offset conv runs as an XLA conv
        # (reviewer-recommended); an overlapping-window in-kernel im2col could
        # fold it into Pallas as well.
        pw_hwio = self.p_w.transpose(2, 3, 1, 0)               # (k, k, C, 2kk)
        offset = lax.conv_general_dilated(
            x_nhwc, pw_hwio, window_strides=(s, s), padding="VALID",
            dimension_numbers=("NHWC", "HWIO", "NHWC")) + self.p_b
        # Reference's get_p_0 / get_p_n concatenate [col, row]: the first k*k
        # offset channels are column (x) offsets, the last k*k are row (y).
        off_x = offset[..., :kk]
        off_y = offset[..., kk:]

        # ---------------- sampling coordinates p = offset + p_0 + p_n ---------
        m = jnp.arange(kk)
        col_off = (m % k - (k - 1) // 2).astype(jnp.float32)
        row_off = (m // k - (k - 1) // 2).astype(jnp.float32)
        base_x = (p + jnp.arange(w_out) * s).astype(jnp.float32)
        base_y = (p + jnp.arange(h_out) * s).astype(jnp.float32)
        coord_x = off_x + base_x[None, None, :, None] + col_off[None, None, None, :]
        coord_y = off_y + base_y[None, :, None, None] + row_off[None, None, None, :]

        # normalize -> clamp to [-1, 1] -> unnormalize (align_corners=True),
        # exactly mirroring torch.clamp + grid_sample in the reference.
        scale = 2.0 / (P - 1)
        gx = jnp.clip(coord_x * scale - 1.0, -1.0, 1.0)
        gy = jnp.clip(coord_y * scale - 1.0, -1.0, 1.0)
        pix_x = (gx + 1.0) * 0.5 * (P - 1)
        pix_y = (gy + 1.0) * 0.5 * (P - 1)

        # top-left corner clamped to [0, P-2] so the (2,2) window always fits;
        # at pix == P-1 the fractional weight becomes 1, which reproduces
        # grid_sample's zeros-padding behaviour at the boundary exactly.
        hi = float(max(P - 2, 0))
        x0f = jnp.clip(jnp.floor(pix_x), 0.0, hi)
        y0f = jnp.clip(jnp.floor(pix_y), 0.0, hi)
        fx = pix_x - x0f
        fy = pix_y - y0f
        x0i = x0f.astype(jnp.int32)
        y0i = y0f.astype(jnp.int32)

        # ---------------- single gather of (2,2,C) corner windows -------------
        # TODO(synk): the data-dependent bilinear gather has no efficient
        # Pallas/TPU lowering (per-element addresses); it stays as one XLA
        # gather of 2x2xC windows feeding the fused Pallas kernel.
        x_bf = x_nhwc.astype(jnp.bfloat16)
        L = h_out * w_out * kk
        ys = y0i.reshape(N, L)
        xs = x0i.reshape(N, L)

        def _one_window(img, yy, xx):
            return lax.dynamic_slice(img, (yy, xx, 0), (2, 2, C))

        gather_img = jax.vmap(_one_window, in_axes=(None, 0, 0))
        corners = jax.vmap(gather_img, in_axes=(0, 0, 0))(x_bf, ys, xs)
        # (N, L, 2, 2, C) -> (M, kk*4*C) with K4 order (tap, corner, channel);
        # pure reshape, no transpose.
        K4 = kk * 4 * C
        v_cat = corners.reshape(M, K4)

        # per-(tap, corner) bilinear weights, corner order (00, 01, 10, 11)
        w00 = (1.0 - fy) * (1.0 - fx)
        w01 = (1.0 - fy) * fx
        w10 = fy * (1.0 - fx)
        w11 = fy * fx
        w_cat = jnp.stack([w00, w01, w10, w11], axis=-1).reshape(M, kk * 4)

        # constant 0/1 matrix broadcasting a (tap, corner) weight over C channels
        bmat = jnp.repeat(jnp.eye(kk * 4, dtype=jnp.float32), C, axis=1)

        # conv weight in (tap, channel) order, stacked over the 4 corners so the
        # corner sum is absorbed into the MXU contraction.
        wc = self.w.transpose(2, 3, 1, 0).reshape(kk, C, self.cout)
        wc_stack = jnp.broadcast_to(
            wc[:, None, :, :], (kk, 4, C, self.cout)).reshape(K4, self.cout)

        # ---------------- fused bilinear combine + conv (Pallas) --------------
        out = _deform_sample_conv(v_cat, w_cat, bmat, wc_stack, self.b)  # (M, Cout) bf16
        out = out.reshape(N, h_out, w_out, self.cout)
        out = jnp.transpose(out, (0, 3, 1, 2)).astype(jnp.float32)       # NCHW f32
        return out


if __name__ == "__main__":
    key = jax.random.PRNGKey(0)
    kx, kparams, ko1, ko2 = jax.random.split(key, 4)

    N, C, H, W = 2, 4, 16, 16
    x = jax.random.normal(kx, (N, C, H, W), jnp.float32)

    model = DeformConvV1(in_channels=C, out_channels=8, kernel_size=3,
                         stride=1, padding=1, key=kparams)
    # The reference zero-inits p_conv (so offsets would all be zero); give it
    # small random weights here purely to exercise the fractional-sampling path
    # in this smoke test.
    model.p_w = 0.05 * jax.random.normal(ko1, model.p_w.shape, jnp.float32)
    model.p_b = 0.05 * jax.random.normal(ko2, model.p_b.shape, jnp.float32)

    fwd = jax.jit(model.__call__)
    y = jax.block_until_ready(fwd(x))
    assert y.shape == (N, 8, 16, 16), y.shape
    assert bool(jnp.all(jnp.isfinite(y)))
    print("KERNEL_OK")
</pallas_src>

<mosaic_0001>
module attributes {stable_mosaic.version = 11 : i64} {
  func.func @_deform_kernel(%arg0: i32, %arg1: memref<128x144xbf16, #tpu.memory_space<vmem>>, %arg2: memref<128x36xf32, #tpu.memory_space<vmem>>, %arg3: memref<36x144xf32, #tpu.memory_space<vmem>>, %arg4: memref<144x128xbf16, #tpu.memory_space<vmem>>, %arg5: memref<1x128xf32, #tpu.memory_space<vmem>>, %arg6: memref<128x128xbf16, #tpu.memory_space<vmem>>) attributes {dimension_semantics = [#tpu.dimension_semantics<parallel>], iteration_bounds = array<i64: 4>, scalar_prefetch = 0 : i64, scratch_operands = 0 : i64, tpu.core_type = #tpu.core_type<tc>, window_params = [{transform_indices = @transform_0, window_bounds = array<i64: 128, 144>}, {transform_indices = @transform_1, window_bounds = array<i64: 128, 36>}, {pipeline_mode = #tpu.pipeline_mode<synchronous>, transform_indices = @transform_2, window_bounds = array<i64: 36, 144>}, {pipeline_mode = #tpu.pipeline_mode<synchronous>, transform_indices = @transform_3, window_bounds = array<i64: 144, 128>}, {pipeline_mode = #tpu.pipeline_mode<synchronous>, transform_indices = @transform_4, window_bounds = array<i64: 1, 128>}, {transform_indices = @transform_5, window_bounds = array<i64: 128, 128>}]} {
    %c0 = arith.constant 0 : index
    %c0_0 = arith.constant 0 : index
    %0 = vector.load %arg2[%c0, %c0_0] : memref<128x36xf32, #tpu.memory_space<vmem>>, vector<128x36xf32>
    %c0_1 = arith.constant 0 : index
    %c0_2 = arith.constant 0 : index
    %1 = vector.load %arg3[%c0_1, %c0_2] : memref<36x144xf32, #tpu.memory_space<vmem>>, vector<36x144xf32>
    %cst = arith.constant dense<0.000000e+00> : vector<128x144xf32>
    %2 = tpu.matmul %0, %1, %cst {dimension_numbers = #tpu.dot_dimension_numbers<[1], [0], [0], [1], [0, 0, 1, 1], [], []>} : vector<128x36xf32>, vector<36x144xf32>, vector<128x144xf32> -> vector<128x144xf32>
    %3 = arith.truncf %2 : vector<128x144xf32> to vector<128x144xbf16>
    %c0_3 = arith.constant 0 : index
    %c0_4 = arith.constant 0 : index
    %4 = vector.load %arg1[%c0_3, %c0_4] : memref<128x144xbf16, #tpu.memory_space<vmem>>, vector<128x144xbf16>
    %5 = arith.mulf %3, %4 : vector<128x144xbf16>
    %c0_5 = arith.constant 0 : index
    %c0_6 = arith.constant 0 : index
    %6 = vector.load %arg4[%c0_5, %c0_6] : memref<144x128xbf16, #tpu.memory_space<vmem>>, vector<144x128xbf16>
    %cst_7 = arith.constant dense<0.000000e+00> : vector<128x128xf32>
    %7 = tpu.matmul %5, %6, %cst_7 {dimension_numbers = #tpu.dot_dimension_numbers<[1], [0], [0], [1], [0, 0, 1, 1], [], []>} : vector<128x144xbf16>, vector<144x128xbf16>, vector<128x128xf32> -> vector<128x128xf32>
    %c0_8 = arith.constant 0 : index
    %c0_9 = arith.constant 0 : index
    %8 = vector.load %arg5[%c0_8, %c0_9] : memref<1x128xf32, #tpu.memory_space<vmem>>, vector<1x128xf32>
    %9 = vector.broadcast %8 : vector<1x128xf32> to vector<128x128xf32>
    %10 = arith.addf %7, %9 : vector<128x128xf32>
    %11 = arith.truncf %10 : vector<128x128xf32> to vector<128x128xbf16>
    %c0_10 = arith.constant 0 : index
    %c0_11 = arith.constant 0 : index
    %12 = vector.load %arg6[%c0_10, %c0_11] : memref<128x128xbf16, #tpu.memory_space<vmem>>, vector<128x128xbf16>
    tpu.vector_store %arg6[%c0_10, %c0_11], %11 {strides = array<i32>} : memref<128x128xbf16, #tpu.memory_space<vmem>>, vector<128x128xbf16>,
    return
  }
  func.func @transform_0(%arg0: i32) -> (i32, i32) {
    %c0_i32 = arith.constant 0 : i32
    %c0_i32_0 = arith.constant 0 : i32
    return %arg0, %c0_i32 : i32, i32
  }
  func.func @transform_1(%arg0: i32) -> (i32, i32) {
    %c0_i32 = arith.constant 0 : i32
    %c0_i32_0 = arith.constant 0 : i32
    return %arg0, %c0_i32 : i32, i32
  }
  func.func @transform_2(%arg0: i32) -> (i32, i32) {
    %c0_i32 = arith.constant 0 : i32
    %c0_i32_0 = arith.constant 0 : i32
    %c0_i32_1 = arith.constant 0 : i32
    return %c0_i32, %c0_i32_0 : i32, i32
  }
  func.func @transform_3(%arg0: i32) -> (i32, i32) {
    %c0_i32 = arith.constant 0 : i32
    %c0_i32_0 = arith.constant 0 : i32
    %c0_i32_1 = arith.constant 0 : i32
    return %c0_i32, %c0_i32_0 : i32, i32
  }
  func.func @transform_4(%arg0: i32) -> (i32, i32) {
    %c0_i32 = arith.constant 0 : i32
    %c0_i32_0 = arith.constant 0 : i32
    %c0_i32_1 = arith.constant 0 : i32
    return %c0_i32, %c0_i32_0 : i32, i32
  }
  func.func @transform_5(%arg0: i32) -> (i32, i32) {
    %c0_i32 = arith.constant 0 : i32
    %c0_i32_0 = arith.constant 0 : i32
    return %arg0, %c0_i32 : i32, i32
  }
}

</mosaic_0001>

<bundles_post_ra>
// kernel: a_call__.1
= control target key start
LH: loop header
LB: loop body
LE: loop exit
PB: predicated region body
PF: predicated region fallthrough
CT: control target
= control target key end

     0   :  { %s1221_s18 = smov 0   ;;  %s1413_s0 = inlined_call_operand.vmem [shape: bf16[512,144], index: 0, kind: input, shape index: {}]   ;;  %s1414_s1 = inlined_call_operand.vmem [shape: f32[512,36], index: 1, kind: input, shape index: {}]   ;;  %s1415_s2 = inlined_call_operand.vmem [shape: f32[36,144], index: 2, kind: input, shape index: {}]   ;;  %s1416_s3 = inlined_call_operand.vmem [shape: bf16[144,128], index: 3, kind: input, shape index: {}]   ;;  %s1417_s4 = inlined_call_operand.vmem [shape: f32[1,128], index: 4, kind: input, shape index: {}]   ;;  %s1418_s5 = inlined_call_operand.vmem [shape: bf16[512,128], index: 5, kind: output, shape index: {}]  }
   0x1 LB: > { %s974_s19 = sadd.s32 4294967295, %s1187_s18   ;;  %p978_p0 = scmp.ge.s32.totalorder %s1187_s18, 1  ;;  %s1187_s18 = sphi %s1221_s18, %s15_s18  }
   0x2   : > { %p200_p1 = scmp.lt.s32.totalorder %s1187_s18, 5 }
   0x4   : > { %p201_p2 = pnand %p978_p0, %p200_p1 }
   0x5   : > { %s979_s28 = sshll.u32 (!%p201_p2), %s974_s19, 4 }
   0x6   : > { %204 = sbr.rel (%p201_p2) target bundleno = 484 (0x1e4), region = 40  ;;  %p235_p3 = scmp.lt.s32.totalorder (!%p201_p2), %s979_s28, 63 }
   0xb   : > { %v279_v0 = vld [vmem:[%s1415_s2 + $0x48] sm:$0xf]  ;;  %vm329_vm0 = vcmask 1043456   ;;  %v278_v1 = vld [vmem:[%s1415_s2 + $0x40] sm:$0xf]  ;;  %v277_v2 = vld [vmem:[%s1415_s2 + $0x38] sm:$0xff] }
   0xc   : > { %986 = vmatprep.subr.msk.mxu0 %vm329_vm0, %v279_v0  ;;  %v276_v3 = vld [vmem:[%s1415_s2 + $0x30] sm:$0xff]  ;;  %v275_v4 = vld [vmem:[%s1415_s2 + $0x28] sm:$0xff]  ;;  %v274_v5 = vld [vmem:[%s1415_s2 + $0x20] sm:$0xff]  ;;  %v1189_v6 = vmov 0.0   ;;  %v1190_v8 = vmov 0   ;;  %s1420_s28 = smov (!%p235_p3, %s979_s28), 63 }
   0xd   : > { %987 = vmatpush1.msk.msra.mxu0 %vm329_vm0, %v278_v1  ;;  %400 = vmatprep.mubr.f32.mxu0 %v1189_v6  ;;  %v273_v7 = vld [vmem:[%s1415_s2 + $0x18] sm:$0xff]  ;;  %v272_v10 = vld [vmem:[%s1415_s2 + $0x10] sm:$0xff]  ;;  %v271_v11 = vld [vmem:[%s1415_s2 + $0x8] sm:$0xff]  ;;  %s1056_s16 = sshll.u32 %s1420_s28, 3  ;;  %vm280_vm1 = vcmask 293888   ;;  %vm704_vm2 = vcmask 130048  }
   0xe   : > { %360 = vmatprep.subr.mxu0 %v277_v2  ;;  %1120 = vmatprep.subr.bf16.mxu1 %v1190_v8  ;;  %v1148_v9 = vld [vmem:[%s1416_s3 + $0x38] sm:$0xff]   ;;  %v270_v12 = vld [vmem:[%s1415_s2] sm:$0xff]  ;;  %s1272_s22 = scalar_lea.vmem %s1414_s1, %s1056_s16  ;;  %v1149_v14 = vld [vmem:[%s1416_s3 + $0x30] sm:$0xff]   ;;  %s1357_s13 = scalar_lea.vmem %s1413_s0, %s1056_s16 }
   0xf   : > { %361 = vmatpush1.msra.mxu0 %v276_v3  ;;  %1129 = vmatpush1.bf16.msra.mxu1 %v1148_v9  ;;  %v254_v13 = vld [vmem:[%s1272_s22] sm:$0xff]  ;;  %v255_v15 = vld [vmem:[%s1272_s22 + $0x8] sm:$0xff]  ;;  %v256_v18 = vld [vmem:[%s1272_s22 + $0x10] sm:$0xff]  ;;  %s985_s21 = sshll.u32 %s1420_s28, 2 }
  0x10   : > { %362 = vmatprep.subr.mxu0 %v275_v4  ;;  %1121 = vmatprep.subr.bf16.mxu1 %v1190_v8  ;;  %v1150_v16 = vld [vmem:[%s1416_s3 + $0x28] sm:$0xff]   ;;  %v1151_v17 = vld [vmem:[%s1416_s3 + $0x20] sm:$0xff]   ;;  %v257_v19 = vld [vmem:[%s1272_s22 + $0x18] sm:$0xff]  ;;  %s1400_s24 = scalar_lea.vmem %s1418_s5, %s985_s21 }
  0x11   : > { %363 = vmatpush1.msra.mxu0 %v274_v5  ;;  %v1152_v20 = vld [vmem:[%s1416_s3 + $0x18] sm:$0xff]   ;;  %v258_v21 = vld [vmem:[%s1272_s22 + $0x20] sm:$0xff]  ;;  %v1153_v22 = vld [vmem:[%s1416_s3 + $0x10] sm:$0xff]  }
  0x12   : > { %364 = vmatprep.subr.mxu0 %v273_v7  ;;  %v259_v23 = vld [vmem:[%s1272_s22 + $0x28] sm:$0xff]  ;;  %v260_v24 = vld [vmem:[%s1272_s22 + $0x30] sm:$0xff]  ;;  %v261_v25 = vld [vmem:[%s1272_s22 + $0x38] sm:$0xff] }
  0x13   : > { %365 = vmatpush1.msra.mxu0 %v272_v10  ;;  %1130 = vmatpush1.bf16.msra.mxu1 %v1149_v14  ;;  %v262_v26 = vld [vmem:[%s1272_s22 + $0x40] sm:$0xff]  ;;  %v263_v27 = vld [vmem:[%s1272_s22 + $0x48] sm:$0xff]  ;;  %v264_v28 = vld [vmem:[%s1272_s22 + $0x50] sm:$0xff] }
  0x14   : > { %366 = vmatprep.subr.mxu0 %v271_v11  ;;  %1122 = vmatprep.subr.bf16.mxu1 %v1190_v8  ;;  %v265_v29 = vld [vmem:[%s1272_s22 + $0x58] sm:$0xff]  ;;  %v266_v30 = vld [vmem:[%s1272_s22 + $0x60] sm:$0xff]  ;;  %v267_v31 = vld [vmem:[%s1272_s22 + $0x68] sm:$0xff] }
  0x15   : > { %367 = vmatpush1.msra.mxu0 %v270_v12  ;;  %v268_v32 = vld [vmem:[%s1272_s22 + $0x70] sm:$0xff]  ;;  %v269_v33 = vld [vmem:[%s1272_s22 + $0x78] sm:$0xff]  ;;  %v1154_v34 = vld [vmem:[%s1416_s3 + $0x8] sm:$0xff]  }
  0x16   : > { %988 = vmatmul.mubr.msk.f32.vlgmr.msra.gmra.mxu0 %vm280_vm1, %v254_v13  ;;  %729 = vmatprep.subr.bf16.mxu0 %v1190_v8  ;;  %v1157_v35 = vld [vmem:[%s1416_s3] sm:$0xff]   ;;  %v1162_v50 = vld [vmem:[%s1357_s13 + $0x14] ss:$8 sps:$4 sm:$0xff]   ;;  %v1160_v52 = vld [vmem:[%s1357_s13 + $0x10] ss:$8 sps:$4 sm:$0xff]  }
  0x17   : > { %406 = vmatprep.mubr.f32.mxu0 %v1189_v6  ;;  %730 = vmatpush1.bf16.msra.mxu0 %v1148_v9  ;;  %v1159_v36 = vld [vmem:[%s1416_s3 + $0x40] sm:$0xff]  }
  0x18   : > { %731 = vmatprep.subr.bf16.mxu0 %v1190_v8  ;;  %1131 = vmatpush1.bf16.msra.mxu1 %v1150_v16  ;;  %v1158_v40 = vld [vmem:[%s1357_s13 + $0x4] ss:$8 sps:$4 sm:$0xff]   ;;  %v1155_v42 = vld [vmem:[%s1357_s13] ss:$8 sps:$4 sm:$0xff]  }
  0x19   : > { %1123 = vmatprep.subr.bf16.mxu1 %v1190_v8  ;;  %v1165_v60 = vld [vmem:[%s1357_s13 + $0x24] ss:$8 sps:$4 sm:$0xff]   ;;  %v1163_v62 = vld [vmem:[%s1357_s13 + $0x20] ss:$8 sps:$4 sm:$0xff]  }
  0x1a   : > { %989 = vmatmul.mubr.msk.f32.gmra.mxu0 %vm280_vm1, %v255_v15 }
  0x1b   : > { %412 = vmatprep.mubr.f32.mxu0 %v1189_v6  ;;  %732 = vmatpush1.bf16.msra.mxu0 %v1149_v14 }
  0x1c   : > { %733 = vmatprep.subr.bf16.mxu0 %v1190_v8  ;;  %1132 = vmatpush1.bf16.msra.mxu1 %v1151_v17 }
  0x1d   : > { %1124 = vmatprep.subr.bf16.mxu1 %v1190_v8 }
  0x1e   : > { %990 = vmatmul.mubr.msk.f32.gmra.mxu0 %vm280_vm1, %v256_v18  ;;  %v1169_v18 = vld [vmem:[%s1357_s13 + $0x40] ss:$8 sps:$4 sm:$0xff]  }
  0x1f   : > { %418 = vmatprep.mubr.f32.mxu0 %v1189_v6  ;;  %734 = vmatpush1.bf16.msra.mxu0 %v1150_v16  ;;  %v1171_v16 = vld [vmem:[%s1357_s13 + $0x44] ss:$8 sps:$4 sm:$0xff]  }
  0x20   : > { %735 = vmatprep.subr.bf16.mxu0 %v1190_v8  ;;  %1133 = vmatpush1.bf16.msra.mxu1 %v1152_v20 }
  0x21   : > { %1125 = vmatprep.subr.bf16.mxu1 %v1190_v8 }
  0x22   : > { %991 = vmatmul.mubr.msk.f32.gmra.mxu0 %vm280_vm1, %v257_v19 }
  0x23   : > { %424 = vmatprep.mubr.f32.mxu0 %v1189_v6  ;;  %736 = vmatpush1.bf16.msra.mxu0 %v1151_v17 }
  0x24   : > { %737 = vmatprep.subr.bf16.mxu0 %v1190_v8  ;;  %1134 = vmatpush1.bf16.msra.mxu1 %v1153_v22 }
  0x25   : > { %1126 = vmatprep.subr.bf16.mxu1 %v1190_v8 }
  0x26   : > { %992 = vmatmul.mubr.msk.f32.gmra.mxu0 %vm280_vm1, %v258_v21 }
  0x27   : > { %430 = vmatprep.mubr.f32.mxu0 %v1189_v6  ;;  %738 = vmatpush1.bf16.msra.mxu0 %v1152_v20 }
  0x28   : > { %739 = vmatprep.subr.bf16.mxu0 %v1190_v8  ;;  %1135 = vmatpush1.bf16.msra.mxu1 %v1154_v34 }
  0x29   : > { %1127 = vmatprep.subr.bf16.mxu1 %v1190_v8 }
  0x2a   : > { %993 = vmatmul.mubr.msk.f32.gmra.mxu0 %vm280_vm1, %v259_v23 }
  0x2b   : > { %436 = vmatprep.mubr.f32.mxu0 %v1189_v6  ;;  %740 = vmatpush1.bf16.msra.mxu0 %v1153_v22 }
  0x2c   : > { %741 = vmatprep.subr.bf16.mxu0 %v1190_v8  ;;  %1136 = vmatpush1.bf16.msra.mxu1 %v1157_v35 }
  0x2d   : > { %1128 = vmatprep.subr.bf16.mxu1 %v1190_v8 }
  0x2e   : > { %994 = vmatmul.mubr.msk.f32.gmra.mxu0 %vm280_vm1, %v260_v24 }
  0x2f   : > { %442 = vmatprep.mubr.f32.mxu0 %v1189_v6  ;;  %742 = vmatpush1.bf16.msra.mxu0 %v1154_v34 }
  0x30   : > { %743 = vmatprep.subr.bf16.mxu0 %v1190_v8  ;;  %1137 = vmatpush2.bf16.msra.mxu1 %v1159_v36 }
  0x32   : > { %995 = vmatmul.mubr.msk.f32.gmra.mxu0 %vm280_vm1, %v261_v25 }
  0x33   : > { %448 = vmatprep.mubr.f32.mxu0 %v1189_v6  ;;  %744 = vmatpush1.bf16.msra.mxu0 %v1157_v35 }
  0x34   : > { %759 = vmatprep.subr.bf16.mxu0 %v1190_v8  ;;  %v1166_v8 = vld [vmem:[%s1357_s13 + $0x30] ss:$8 sps:$4 sm:$0xff]  }
  0x36   : > { %996 = vmatmul.mubr.msk.f32.gmra.mxu0 %vm280_vm1, %v262_v26  ;;  %v1174_v26 = vld [vmem:[%s1357_s13 + $0x54] ss:$8 sps:$4 sm:$0xff]  }
  0x37   : > { %454 = vmatprep.mubr.f32.mxu0 %v1189_v6  ;;  %760 = vmatpush2.bf16.msra.mxu0 %v1159_v36  ;;  %v1177_v36 = vld [vmem:[%s1357_s13 + $0x64] ss:$8 sps:$4 sm:$0xff]  }
  0x3a   : > { %997 = vmatmul.mubr.msk.f32.gmra.mxu0 %vm280_vm1, %v263_v27 }
  0x3b   : > { %460 = vmatprep.mubr.f32.mxu0 %v1189_v6 }
  0x3e   : > { %998 = vmatmul.mubr.msk.f32.gmra.mxu0 %vm280_vm1, %v264_v28  ;;  %v1172_v28 = vld [vmem:[%s1357_s13 + $0x50] ss:$8 sps:$4 sm:$0xff]  }
  0x3f   : > { %466 = vmatprep.mubr.f32.mxu0 %v1189_v6 }
  0x42   : > { %999 = vmatmul.mubr.msk.f32.gmra.mxu0 %vm280_vm1, %v265_v29 }
  0x43   : > { %472 = vmatprep.mubr.f32.mxu0 %v1189_v6 }
  0x46   : > { %1000 = vmatmul.mubr.msk.f32.gmra.mxu0 %vm280_vm1, %v266_v30 }
  0x47   : > { %478 = vmatprep.mubr.f32.mxu0 %v1189_v6 }
  0x4a   : > { %1001 = vmatmul.mubr.msk.f32.gmra.mxu0 %vm280_vm1, %v267_v31 }
  0x4b   : > { %484 = vmatprep.mubr.f32.mxu0 %v1189_v6 }
  0x4e   : > { %1002 = vmatmul.mubr.msk.f32.gmra.mxu0 %vm280_vm1, %v268_v32 }
  0x4f   : > { %490 = vmatprep.mubr.f32.mxu0 %v1189_v6  ;;  %v1168_v6 = vld [vmem:[%s1357_s13 + $0x34] ss:$8 sps:$4 sm:$0xff]  }
  0x52   : > { %1003 = vmatmul.mubr.msk.f32.gmra.mxu0 %vm280_vm1, %v269_v33 }
  0xd6   : > { %v402_v37 = vpop.f32.mrf.mxu0 }
  0xd8   : > { %v404_v38 = vpop.f32.mrf.mxu0 }
  0xda   : > { %v408_v39 = vpop.f32.mrf.mxu0 }
  0xdb   : > { %v497_v41 = vpack.c.bf16 %v408_v39, %v402_v37 }
  0xdc   : > { %v410_v43 = vpop.f32.mrf.mxu0 }
  0xdd   : > { %v498_v44 = vpack.c.bf16 %v410_v43, %v404_v38  ;;  %v609_v47 = vmul.bf16 %v1155_v42, %v497_v41  ;;  %v1175_v38 = vld [vmem:[%s1357_s13 + $0x60] ss:$8 sps:$4 sm:$0xff]  }
  0xde   : > { %v414_v45 = vpop.f32.mrf.mxu0 }
  0xdf   : > { %v610_v46 = vmul.bf16 %v1158_v40, %v498_v44 }
  0xe0   : > { %v416_v48 = vpop.f32.mrf.mxu0 }
  0xe1   : > { %1030 = vmatprep.mubr.msk.bf16.mxu0 %vm704_vm2, %v610_v46  ;;  %v1180_v46 = vld [vmem:[%s1357_s13 + $0x74] ss:$8 sps:$4 sm:$0xff]  }
  0xe2   : > { %v420_v49 = vpop.f32.mrf.mxu0  ;;  %762 = vmatmul.mubr.bf16.vlgmr.msra.gmra.mxu0 %v609_v47 }
  0xe3   : > { %v499_v51 = vpack.c.bf16 %v420_v49, %v414_v45 }
  0xe4   : > { %v422_v53 = vpop.f32.mrf.mxu0 }
  0xe5   : > { %v500_v54 = vpack.c.bf16 %v422_v53, %v416_v48  ;;  %v611_v57 = vmul.bf16 %v1160_v52, %v499_v51  ;;  %v1178_v48 = vld [vmem:[%s1357_s13 + $0x70] ss:$8 sps:$4 sm:$0xff]  }
  0xe6   : > { %v426_v55 = vpop.f32.mrf.mxu0 }
  0xe7   : > { %v612_v56 = vmul.bf16 %v1162_v50, %v500_v54  ;;  %v1020_v54 = vld [vmem:[%s1417_s4] ss:$0 sm:$0xff] }
  0xe8   : > { %v428_v58 = vpop.f32.mrf.mxu0 }
  0xe9   : > { %1031 = vmatprep.mubr.msk.bf16.mxu1 %vm704_vm2, %v612_v56 }
  0xea   : > { %v432_v59 = vpop.f32.mrf.mxu0  ;;  %770 = vmatmul.mubr.bf16.vlgmr.msra.gmra.mxu1 %v611_v57 }
  0xeb   : > { %v501_v61 = vpack.c.bf16 %v432_v59, %v426_v55 }
  0xec   : > { %v434_v63 = vpop.f32.mrf.mxu0 }
  0xed   : > { %v502_v0 = vpack.c.bf16 %v434_v63, %v428_v58  ;;  %v613_v3 = vmul.bf16 %v1163_v62, %v501_v61 }
  0xee   : > { %v438_v1 = vpop.f32.mrf.mxu0 }
  0xef   : > { %v614_v2 = vmul.bf16 %v1165_v60, %v502_v0 }
  0xf0   : > { %v440_v4 = vpop.f32.mrf.mxu0 }
  0xf1   : > { %1032 = vmatprep.mubr.msk.bf16.mxu1 %vm704_vm2, %v614_v2 }
  0xf2   : > { %v444_v5 = vpop.f32.mrf.mxu0  ;;  %778 = vmatmul.mubr.bf16.gmra.mxu1 %v613_v3 }
  0xf3   : > { %v503_v7 = vpack.c.bf16 %v444_v5, %v438_v1 }
  0xf4   : > { %v446_v9 = vpop.f32.mrf.mxu0 }
  0xf5   : > { %v504_v10 = vpack.c.bf16 %v446_v9, %v440_v4  ;;  %v615_v13 = vmul.bf16 %v1166_v8, %v503_v7 }
  0xf6   : > { %v450_v11 = vpop.f32.mrf.mxu0 }
  0xf7   : > { %v616_v12 = vmul.bf16 %v1168_v6, %v504_v10 }
  0xf8   : > { %v452_v14 = vpop.f32.mrf.mxu0 }
  0xf9   : > { %1033 = vmatprep.mubr.msk.bf16.mxu1 %vm704_vm2, %v616_v12 }
  0xfa   : > { %v456_v15 = vpop.f32.mrf.mxu0  ;;  %786 = vmatmul.mubr.bf16.gmra.mxu1 %v615_v13 }
  0xfb   : > { %v505_v17 = vpack.c.bf16 %v456_v15, %v450_v11 }
  0xfc   : > { %v458_v19 = vpop.f32.mrf.mxu0 }
  0xfd   : > { %v506_v20 = vpack.c.bf16 %v458_v19, %v452_v14  ;;  %v617_v23 = vmul.bf16 %v1169_v18, %v505_v17 }
  0xfe   : > { %v462_v21 = vpop.f32.mrf.mxu0 }
  0xff   : > { %v618_v22 = vmul.bf16 %v1171_v16, %v506_v20 }
 0x100   : > { %v464_v24 = vpop.f32.mrf.mxu0 }
 0x101   : > { %1034 = vmatprep.mubr.msk.bf16.mxu1 %vm704_vm2, %v618_v22 }
 0x102   : > { %v468_v25 = vpop.f32.mrf.mxu0  ;;  %794 = vmatmul.mubr.bf16.gmra.mxu1 %v617_v23 }
 0x103   : > { %v507_v27 = vpack.c.bf16 %v468_v25, %v462_v21 }
 0x104   : > { %v470_v29 = vpop.f32.mrf.mxu0 }
 0x105   : > { %v508_v30 = vpack.c.bf16 %v470_v29, %v464_v24  ;;  %v619_v33 = vmul.bf16 %v1172_v28, %v507_v27 }
 0x106   : > { %v474_v31 = vpop.f32.mrf.mxu0 }
 0x107   : > { %v620_v32 = vmul.bf16 %v1174_v26, %v508_v30 }
 0x108   : > { %v476_v34 = vpop.f32.mrf.mxu0 }
 0x109   : > { %1035 = vmatprep.mubr.msk.bf16.mxu1 %vm704_vm2, %v620_v32 }
 0x10a   : > { %v480_v35 = vpop.f32.mrf.mxu0  ;;  %802 = vmatmul.mubr.bf16.gmra.mxu1 %v619_v33 }
 0x10b   : > { %v509_v37 = vpack.c.bf16 %v480_v35, %v474_v31 }
 0x10c   : > { %v482_v39 = vpop.f32.mrf.mxu0 }
 0x10d   : > { %v510_v40 = vpack.c.bf16 %v482_v39, %v476_v34  ;;  %v621_v43 = vmul.bf16 %v1175_v38, %v509_v37 }
 0x10e   : > { %v486_v41 = vpop.f32.mrf.mxu0 }
 0x10f   : > { %v622_v42 = vmul.bf16 %v1177_v36, %v510_v40 }
 0x110   : > { %v488_v44 = vpop.f32.mrf.mxu0 }
 0x111   : > { %1036 = vmatprep.mubr.msk.bf16.mxu1 %vm704_vm2, %v622_v42 }
 0x112   : > { %v492_v45 = vpop.f32.mrf.mxu0  ;;  %810 = vmatmul.mubr.bf16.gmra.mxu1 %v621_v43 }
 0x113   : > { %v511_v47 = vpack.c.bf16 %v492_v45, %v486_v41 }
 0x114   : > { %v494_v49 = vpop.f32.mrf.mxu0 }
 0x115   : > { %v512_v50 = vpack.c.bf16 %v494_v49, %v488_v44  ;;  %v623_v52 = vmul.bf16 %v1178_v48, %v511_v47 }
 0x117   : > { %v624_v51 = vmul.bf16 %v1180_v46, %v512_v50 }
 0x119   : > { %1037 = vmatprep.mubr.msk.bf16.mxu1 %vm704_vm2, %v624_v51 }
 0x11a   : > { %818 = vmatmul.mubr.bf16.gmra.mxu1 %v623_v52 }
 0x1a2   : > { %v763_v53 = vpop.f32.mrf.mxu0 }
 0x1a3   : > { %v764_v57 = vadd.f32 %v1020_v54, %v763_v53 }
 0x1a4   : > { %v765_v55 = vpop.f32.mrf.mxu0 }
 0x1a6   : > { %v766_v56 = vpop.f32.mrf.mxu0 }
 0x1a7   : > { %v767_v58 = vadd.f32 %v1020_v54, %v766_v56 }
 0x1a8   : > { %v768_v59 = vpop.f32.mrf.mxu0 }
 0x1a9   : > { %v1076_v60 = vpack.c.bf16 %v767_v58, %v764_v57 }
 0x1aa   : > { %v771_v61 = vpop.f32.mrf.mxu1 }
 0x1ab   : > { %1077 = vst [vmem:[%s1400_s24] sm:$0xff] %v1076_v60   ;;  %v772_v0 = vadd.f32 %v1020_v54, %v771_v61 }
 0x1ac   : > { %v773_v62 = vpop.f32.mrf.mxu1 }
 0x1ae   : > { %v774_v63 = vpop.f32.mrf.mxu1 }
 0x1af   : > { %v775_v1 = vadd.f32 %v1020_v54, %v774_v63 }
 0x1b0   : > { %v776_v2 = vpop.f32.mrf.mxu1 }
 0x1b1   : > { %v1081_v3 = vpack.c.bf16 %v775_v1, %v772_v0 }
 0x1b2   : > { %v779_v4 = vpop.f32.mrf.mxu1 }
 0x1b3   : > { %1113 = vst [vmem:[%s1400_s24 + $0x8] sm:$0xff] %v1081_v3   ;;  %v780_v7 = vadd.f32 %v1020_v54, %v779_v4 }
 0x1b4   : > { %v781_v5 = vpop.f32.mrf.mxu1 }
 0x1b6   : > { %v782_v6 = vpop.f32.mrf.mxu1 }
 0x1b7   : > { %v783_v8 = vadd.f32 %v1020_v54, %v782_v6 }
 0x1b8   : > { %v784_v9 = vpop.f32.mrf.mxu1 }
 0x1b9   : > { %v1086_v10 = vpack.c.bf16 %v783_v8, %v780_v7 }
 0x1ba   : > { %v787_v11 = vpop.f32.mrf.mxu1 }
 0x1bb   : > { %1114 = vst [vmem:[%s1400_s24 + $0x10] sm:$0xff] %v1086_v10   ;;  %v788_v14 = vadd.f32 %v1020_v54, %v787_v11 }
 0x1bc   : > { %v789_v12 = vpop.f32.mrf.mxu1 }
 0x1be   : > { %v790_v13 = vpop.f32.mrf.mxu1 }
 0x1bf   : > { %v791_v15 = vadd.f32 %v1020_v54, %v790_v13 }
 0x1c0   : > { %v792_v16 = vpop.f32.mrf.mxu1 }
 0x1c1   : > { %v1091_v17 = vpack.c.bf16 %v791_v15, %v788_v14 }
 0x1c2   : > { %v795_v18 = vpop.f32.mrf.mxu1 }
 0x1c3   : > { %1115 = vst [vmem:[%s1400_s24 + $0x18] sm:$0xff] %v1091_v17   ;;  %v796_v21 = vadd.f32 %v1020_v54, %v795_v18 }
 0x1c4   : > { %v797_v19 = vpop.f32.mrf.mxu1 }
 0x1c6   : > { %v798_v20 = vpop.f32.mrf.mxu1 }
 0x1c7   : > { %v799_v22 = vadd.f32 %v1020_v54, %v798_v20 }
 0x1c8   : > { %v800_v23 = vpop.f32.mrf.mxu1 }
 0x1c9   : > { %v1096_v24 = vpack.c.bf16 %v799_v22, %v796_v21 }
 0x1ca   : > { %v803_v25 = vpop.f32.mrf.mxu1 }
 0x1cb   : > { %1116 = vst [vmem:[%s1400_s24 + $0x20] sm:$0xff] %v1096_v24   ;;  %v804_v28 = vadd.f32 %v1020_v54, %v803_v25 }
 0x1cc   : > { %v805_v26 = vpop.f32.mrf.mxu1 }
 0x1ce   : > { %v806_v27 = vpop.f32.mrf.mxu1 }
 0x1cf   : > { %v807_v29 = vadd.f32 %v1020_v54, %v806_v27 }
 0x1d0   : > { %v808_v30 = vpop.f32.mrf.mxu1 }
 0x1d1   : > { %v1101_v31 = vpack.c.bf16 %v807_v29, %v804_v28 }
 0x1d2   : > { %v811_v32 = vpop.f32.mrf.mxu1 }
 0x1d3   : > { %1117 = vst [vmem:[%s1400_s24 + $0x28] sm:$0xff] %v1101_v31   ;;  %v812_v35 = vadd.f32 %v1020_v54, %v811_v32 }
 0x1d4   : > { %v813_v33 = vpop.f32.mrf.mxu1 }
 0x1d6   : > { %v814_v34 = vpop.f32.mrf.mxu1 }
 0x1d7   : > { %v815_v36 = vadd.f32 %v1020_v54, %v814_v34 }
 0x1d8   : > { %v816_v37 = vpop.f32.mrf.mxu1 }
 0x1d9   : > { %v1106_v38 = vpack.c.bf16 %v815_v36, %v812_v35 }
 0x1da   : > { %v819_v39 = vpop.f32.mrf.mxu1 }
 0x1db   : > { %1118 = vst [vmem:[%s1400_s24 + $0x30] sm:$0xff] %v1106_v38   ;;  %v820_v42 = vadd.f32 %v1020_v54, %v819_v39 }
 0x1dc   : > { %v821_v40 = vpop.f32.mrf.mxu1 }
 0x1de   : > { %v822_v41 = vpop.f32.mrf.mxu1 }
 0x1df   : > { %v823_v43 = vadd.f32 %v1020_v54, %v822_v41 }
 0x1e0   : > { %v824_v44 = vpop.f32.mrf.mxu1 }
 0x1e1   : > { %v1111_v45 = vpack.c.bf16 %v823_v43, %v820_v42 }
 0x1e3   : > { %1119 = vst [vmem:[%s1400_s24 + $0x38] sm:$0xff] %v1111_v45  }
 0x1e4 PF: > { %s15_s18 = sadd.s32 1, %s1187_s18  }
 0x1e5   : > { %p12_p4 = scmp.ge.s32.totalorder %s15_s18, 6  }
 0x1e7   :  { %14 = sbr.rel (!%p12_p4) target bundleno = 1 (0x1), region = 73 }

</bundles_post_ra>
